<compile_context>
chip_gen: v7x
topology: tpu7x:2x2x1
jax: 0.10.0
libtpu: 0.0.40
codegen_flags: <defaults>
</compile_context>

<pallas_src>
import jax
import jax.numpy as jnp
from jax.experimental import pallas as pl
from jax.experimental.pallas import tpu as pltpu


def gate_fusion_kernel(z1_ref, z2_ref, x_ref, w_ref, b_ref, out_ref):
    """Fused 1x1-conv + split + gated residual for one (nb, *, tp) block.

    z1_ref : (nb, 2C, tp)  first 2C conv-input channels (was z1)
    z2_ref : (nb,  C, tp)  last C conv-input channels (was z2)
    x_ref  : (nb,  C, tp)  residual input
    w_ref  : (2C, 3C)      1x1-conv weight (filter rows then gate rows)
    b_ref  : (2C, 1)       conv bias
    out_ref: (nb,  C, tp)
    """
    C = out_ref.shape[1]
    w = w_ref[...]                                   # hoisted: loaded once per block
    b = b_ref[...].astype(jnp.float32)
    for i in range(z1_ref.shape[0]):                 # static (unrolled) batch loop
        # On-chip sublane concat replaces the HBM cat(z1, z2): one MXU weight
        # staging and one result drain per block instead of two.
        z = jnp.concatenate([z1_ref[i], z2_ref[i]], axis=0)          # (3C, tp)
        y = jnp.dot(w, z, preferred_element_type=jnp.float32) + b    # (2C, tp) f32
        filt = y[:C, :]                              # sublane split (aligned if C%8==0)
        gate = y[C:, :]
        out = (filt + x_ref[i].astype(jnp.float32)) * jax.nn.sigmoid(gate)
        out_ref[i] = out.astype(out_ref.dtype)


def _largest_multiple_divisor(n, multiple, cap):
    """Largest d <= cap with d % multiple == 0 and n % d == 0 (0 if none)."""
    d = (min(n, cap) // multiple) * multiple
    while d >= multiple:
        if n % d == 0:
            return d
        d -= multiple
    return 0


def _largest_divisor_leq(n, cap):
    """Largest divisor of n that is <= cap (at least 1)."""
    for d in range(min(n, max(cap, 1)), 0, -1):
        if n % d == 0:
            return d
    return 1


def _pick_tiles(N, P, C, act_itemsize, out_itemsize, tile_budget_bytes):
    """(nb, tp): batch-block and pixel-tile sizes.

    tp is a multiple of 128 (unmasked lane-dense stores) or the full pixel
    extent; nb divides N.  Both are sized so the double-buffered I/O tiles and
    the f32 temporaries fit tile_budget_bytes.
    """
    # Per-pixel VMEM bytes: double-buffered z1(2C)+z2(C)+x(C) inputs, C output,
    # plus f32 temporaries (3C concat, 2C matmul result, C gated output).
    bpp = 2 * 4 * C * act_itemsize + 2 * C * out_itemsize + 24 * C
    cap_px = max(128, tile_budget_bytes // max(bpp, 1))

    if P >= 128 and P % 128 == 0:
        tp = _largest_multiple_divisor(P, 128, cap_px) or 128
    else:
        # Full-extent pixel block (always layout-legal).  When P < 128 the
        # stores are partially masked; folding batch into lanes would fix that
        # but costs an HBM transpose per tensor, not worth it at these sizes.
        tp = P

    # Spend leftover budget on batch blocking to amortize per-grid-step cost.
    nb = _largest_divisor_leq(N, max(1, tile_budget_bytes // max(bpp * tp, 1)))

    # Keep >= 2 grid steps when splittable: v7x shards "parallel" axes across
    # its 2 TensorCores, and the pipeline needs >1 step to overlap DMA/compute.
    if (N // nb) * (P // tp) < 2:
        if nb > 1:
            nb = _largest_divisor_leq(N, N // 2)
        elif P % 128 == 0 and P // 128 >= 2:
            tp = _largest_multiple_divisor(P, 128, P // 2) or tp
    return nb, tp


def gate_fusion(z1, z2, x_input1, weight, bias, c_out, *, activation_dtype=None):
    """z1: (N, 2*c_out, H, W), z2: (N, c_out, H, W), x_input1: (N, c_out, H, W)
    weight: (2*c_out, 3*c_out)  (Conv2d 1x1 weight with trailing 1x1 squeezed)
    bias:   (2*c_out,)
    activation_dtype: optionally cast activations + weight (e.g. jnp.bfloat16)
      to halve HBM traffic and MXU pushes on v6e/v7x; accumulation stays f32
      and the output keeps the input dtype.  Default None == exact f32
      semantics of the PyTorch module.
    Returns (N, c_out, H, W) NCHW, matching the PyTorch module."""
    N, _, H, W = z1.shape
    C = int(c_out)
    P = H * W
    out_dtype = z1.dtype

    # NCHW -> (N, C, H*W): pure reshapes, no transpose, no concat.
    z1r = z1.reshape(N, 2 * C, P)
    z2r = z2.reshape(N, C, P)
    xr = x_input1.reshape(N, C, P)
    w = weight.reshape(2 * C, 3 * C)
    b = bias.reshape(2 * C, 1).astype(jnp.float32)

    if activation_dtype is not None:
        z1r = z1r.astype(activation_dtype)
        z2r = z2r.astype(activation_dtype)
        xr = xr.astype(activation_dtype)
        w = w.astype(activation_dtype)

    # Generation-aware VMEM budget: 128 MiB on v5e/v6e, 64 MiB/TC on v7x.
    try:
        vmem_cap = int(pltpu.get_tpu_info().vmem_capacity_bytes)
    except Exception:
        vmem_cap = 64 * 1024 * 1024              # conservative fallback (v7x/TC)
    vmem_limit = max(min((vmem_cap * 3) // 4, 100 * 1024 * 1024),
                     32 * 1024 * 1024)

    # Budget available to the pipelined pixel/batch tiles: subtract the
    # resident (but still double-buffered) weight/bias and compiler headroom.
    act_itemsize = jnp.dtype(z1r.dtype).itemsize
    out_itemsize = jnp.dtype(out_dtype).itemsize
    fixed_bytes = 2 * (w.size * jnp.dtype(w.dtype).itemsize
                       + b.size * jnp.dtype(b.dtype).itemsize)
    tile_budget = max(vmem_limit - fixed_bytes - 4 * 1024 * 1024,
                      2 * 1024 * 1024)

    nb, tp = _pick_tiles(N, P, C, act_itemsize, out_itemsize, tile_budget)
    grid = (N // nb, P // tp)

    out_rows = pl.pallas_call(
        gate_fusion_kernel,
        out_shape=jax.ShapeDtypeStruct((N, C, P), out_dtype),
        grid=grid,
        in_specs=[
            pl.BlockSpec((nb, 2 * C, tp), lambda n, p: (n, 0, p)),   # z1 tile
            pl.BlockSpec((nb, C, tp),     lambda n, p: (n, 0, p)),   # z2 tile
            pl.BlockSpec((nb, C, tp),     lambda n, p: (n, 0, p)),   # x tile
            pl.BlockSpec((2 * C, 3 * C),  lambda n, p: (0, 0)),      # W (resident)
            pl.BlockSpec((2 * C, 1),      lambda n, p: (0, 0)),      # b (resident)
        ],
        out_specs=pl.BlockSpec((nb, C, tp), lambda n, p: (n, 0, p)),
        compiler_params=pltpu.CompilerParams(
            dimension_semantics=("parallel", "parallel"),
            vmem_limit_bytes=vmem_limit,
        ),
    )(z1r, z2r, xr, w, b)

    # (N, C, H*W) -> NCHW: free reshape, no transpose.
    return out_rows.reshape(N, C, H, W)


def gate_fusion_ref(z1, z2, x_input1, weight, bias, c_out):
    """Pure-JAX reference with identical semantics to the PyTorch module."""
    z = jnp.concatenate([z1, z2], axis=1)                        # (N, 3C, H, W)
    y = jnp.einsum("nchw,oc->nohw", z, weight) + bias[None, :, None, None]
    filt = y[:, :c_out]
    gate = y[:, c_out:]
    return (filt + x_input1) * jax.nn.sigmoid(gate)


if __name__ == "__main__":
    key = jax.random.PRNGKey(0)
    k1, k2, k3, k4, k5 = jax.random.split(key, 5)

    # Small shapes consistent with the module: cat(z1, z2) has 3*c_out channels
    # -> z1 has 2*c_out channels, z2 has c_out channels.
    c_out = 8
    N, H, W = 2, 8, 8

    z1 = jax.random.normal(k1, (N, 2 * c_out, H, W), dtype=jnp.float32)
    z2 = jax.random.normal(k2, (N, c_out, H, W), dtype=jnp.float32)
    x_input1 = jax.random.normal(k3, (N, c_out, H, W), dtype=jnp.float32)

    # Deterministic parameter init (Conv2d(3*c_out, 2*c_out, k=1) shapes).
    fan_in = 3 * c_out
    bound = 1.0 / (fan_in ** 0.5)
    weight = jax.random.uniform(k4, (2 * c_out, 3 * c_out),
                                minval=-bound, maxval=bound, dtype=jnp.float32)
    bias = jax.random.uniform(k5, (2 * c_out,),
                              minval=-bound, maxval=bound, dtype=jnp.float32)

    out = gate_fusion(z1, z2, x_input1, weight, bias, c_out)
    out = jax.block_until_ready(out)

    ref = gate_fusion_ref(z1, z2, x_input1, weight, bias, c_out)
    assert out.shape == (N, c_out, H, W)
    assert jnp.allclose(out, ref, atol=1e-5, rtol=1e-5), "mismatch vs reference"

    print("KERNEL_OK")
</pallas_src>

<mosaic_0001>
module attributes {stable_mosaic.version = 11 : i64} {
  func.func @gate_fusion_kernel(%arg0: i32, %arg1: i32, %arg2: memref<1x16x64xf32, #tpu.memory_space<vmem>>, %arg3: memref<1x8x64xf32, #tpu.memory_space<vmem>>, %arg4: memref<1x8x64xf32, #tpu.memory_space<vmem>>, %arg5: memref<16x24xf32, #tpu.memory_space<vmem>>, %arg6: memref<16x1xf32, #tpu.memory_space<vmem>>, %arg7: memref<1x8x64xf32, #tpu.memory_space<vmem>>) attributes {dimension_semantics = [#tpu.dimension_semantics<parallel>, #tpu.dimension_semantics<parallel>], iteration_bounds = array<i64: 2, 1>, scalar_prefetch = 0 : i64, scratch_operands = 0 : i64, tpu.core_type = #tpu.core_type<tc>, window_params = [{transform_indices = @transform_0, window_bounds = array<i64: 1, 16, 64>}, {transform_indices = @transform_1, window_bounds = array<i64: 1, 8, 64>}, {transform_indices = @transform_2, window_bounds = array<i64: 1, 8, 64>}, {pipeline_mode = #tpu.pipeline_mode<synchronous>, transform_indices = @transform_3, window_bounds = array<i64: 16, 24>}, {pipeline_mode = #tpu.pipeline_mode<synchronous>, transform_indices = @transform_4, window_bounds = array<i64: 16, 1>}, {transform_indices = @transform_5, window_bounds = array<i64: 1, 8, 64>}]} {
    %c0 = arith.constant 0 : index
    %c0_0 = arith.constant 0 : index
    %0 = vector.load %arg5[%c0, %c0_0] : memref<16x24xf32, #tpu.memory_space<vmem>>, vector<16x24xf32>
    %c0_1 = arith.constant 0 : index
    %c0_2 = arith.constant 0 : index
    %1 = vector.load %arg6[%c0_1, %c0_2] : memref<16x1xf32, #tpu.memory_space<vmem>>, vector<16x1xf32>
    %c0_3 = arith.constant 0 : index
    %c0_4 = arith.constant 0 : index
    %c0_5 = arith.constant 0 : index
    %2 = vector.load %arg2[%c0_3, %c0_4, %c0_5] : memref<1x16x64xf32, #tpu.memory_space<vmem>>, vector<1x16x64xf32>
    %3 = vector.shape_cast %2 : vector<1x16x64xf32> to vector<16x64xf32>
    %c0_6 = arith.constant 0 : index
    %c0_7 = arith.constant 0 : index
    %c0_8 = arith.constant 0 : index
    %4 = vector.load %arg3[%c0_6, %c0_7, %c0_8] : memref<1x8x64xf32, #tpu.memory_space<vmem>>, vector<1x8x64xf32>
    %5 = vector.shape_cast %4 : vector<1x8x64xf32> to vector<8x64xf32>
    %6 = tpu.concatenate %3, %5 in 0 : vector<16x64xf32>, vector<8x64xf32> -> vector<24x64xf32>
    %cst = arith.constant dense<0.000000e+00> : vector<16x64xf32>
    %7 = tpu.matmul %0, %6, %cst {dimension_numbers = #tpu.dot_dimension_numbers<[1], [0], [0], [1], [0, 0, 1, 1], [], []>} : vector<16x24xf32>, vector<24x64xf32>, vector<16x64xf32> -> vector<16x64xf32>
    %8 = vector.broadcast %1 : vector<16x1xf32> to vector<16x64xf32>
    %9 = arith.addf %7, %8 : vector<16x64xf32>
    %10 = vector.extract_strided_slice %9 {offsets = [0, 0], sizes = [8, 64], strides = [1, 1]} : vector<16x64xf32> to vector<8x64xf32>
    %11 = vector.extract_strided_slice %9 {offsets = [8, 0], sizes = [8, 64], strides = [1, 1]} : vector<16x64xf32> to vector<8x64xf32>
    %c0_9 = arith.constant 0 : index
    %c0_10 = arith.constant 0 : index
    %c0_11 = arith.constant 0 : index
    %12 = vector.load %arg4[%c0_9, %c0_10, %c0_11] : memref<1x8x64xf32, #tpu.memory_space<vmem>>, vector<1x8x64xf32>
    %13 = vector.shape_cast %12 : vector<1x8x64xf32> to vector<8x64xf32>
    %14 = arith.addf %10, %13 : vector<8x64xf32>
    %15 = arith.negf %11 : vector<8x64xf32>
    %16 = math.exp %15 : vector<8x64xf32>
    %cst_12 = arith.constant 1.000000e+00 : f32
    %17 = vector.broadcast %cst_12 : f32 to vector<8x64xf32>
    %18 = arith.addf %17, %16 : vector<8x64xf32>
    %19 = arith.divf %17, %18 : vector<8x64xf32>
    %20 = arith.mulf %14, %19 : vector<8x64xf32>
    %c0_13 = arith.constant 0 : index
    %c0_14 = arith.constant 0 : index
    %c0_15 = arith.constant 0 : index
    %21 = vector.load %arg7[%c0_13, %c0_14, %c0_15] : memref<1x8x64xf32, #tpu.memory_space<vmem>>, vector<1x8x64xf32>
    %22 = vector.shape_cast %21 : vector<1x8x64xf32> to vector<8x64xf32>
    %23 = vector.shape_cast %20 : vector<8x64xf32> to vector<1x8x64xf32>
    tpu.vector_store %arg7[%c0_13, %c0_14, %c0_15], %23 {strides = array<i32>} : memref<1x8x64xf32, #tpu.memory_space<vmem>>, vector<1x8x64xf32>,
    return
  }
  func.func @transform_0(%arg0: i32, %arg1: i32) -> (i32, i32, i32) {
    %c0_i32 = arith.constant 0 : i32
    %c0_i32_0 = arith.constant 0 : i32
    return %arg0, %c0_i32, %arg1 : i32, i32, i32
  }
  func.func @transform_1(%arg0: i32, %arg1: i32) -> (i32, i32, i32) {
    %c0_i32 = arith.constant 0 : i32
    %c0_i32_0 = arith.constant 0 : i32
    return %arg0, %c0_i32, %arg1 : i32, i32, i32
  }
  func.func @transform_2(%arg0: i32, %arg1: i32) -> (i32, i32, i32) {
    %c0_i32 = arith.constant 0 : i32
    %c0_i32_0 = arith.constant 0 : i32
    return %arg0, %c0_i32, %arg1 : i32, i32, i32
  }
  func.func @transform_3(%arg0: i32, %arg1: i32) -> (i32, i32) {
    %c0_i32 = arith.constant 0 : i32
    %c0_i32_0 = arith.constant 0 : i32
    %c0_i32_1 = arith.constant 0 : i32
    return %c0_i32, %c0_i32_0 : i32, i32
  }
  func.func @transform_4(%arg0: i32, %arg1: i32) -> (i32, i32) {
    %c0_i32 = arith.constant 0 : i32
    %c0_i32_0 = arith.constant 0 : i32
    %c0_i32_1 = arith.constant 0 : i32
    return %c0_i32, %c0_i32_0 : i32, i32
  }
  func.func @transform_5(%arg0: i32, %arg1: i32) -> (i32, i32, i32) {
    %c0_i32 = arith.constant 0 : i32
    %c0_i32_0 = arith.constant 0 : i32
    return %arg0, %c0_i32, %arg1 : i32, i32, i32
  }
}

</mosaic_0001>

<bundles_post_ra>
// kernel: tpu_custom_call.1
= control target key start
LH: loop header
LB: loop body
LE: loop exit
PB: predicated region body
PF: predicated region fallthrough
CT: control target
= control target key end

     0   :  { %s1220_s0 = inlined_call_operand.hbm [shape: f32[2,16,64], index: 0, kind: input, shape index: {}]   ;;  %s1221_s1 = inlined_call_operand.vmem [shape: f32[2,8,64], index: 1, kind: input, shape index: {}]   ;;  %s1222_s2 = inlined_call_operand.hbm [shape: f32[2,8,64], index: 2, kind: input, shape index: {}]   ;;  %s1223_s3 = inlined_call_operand.hbm [shape: f32[16,24], index: 3, kind: input, shape index: {}]   ;;  %s1224_s4 = inlined_call_operand.vmem [shape: f32[16,1], index: 4, kind: input, shape index: {}]   ;;  %s1225_s5 = inlined_call_operand.hbm [shape: f32[2,8,64], index: 5, kind: output, shape index: {}]  }
   0x1   :  { %1234 = sst [smem:[#allocation16_spill]] %s1220_s0 }
   0x2   :  { %1235 = sst [smem:[#allocation17_spill]] %s1223_s3 }
   0x3   :  { %10 = vsyncpa [#allocation3], 0 }
   0x4   :  { %12 = vsyncpa [#allocation3 + $0x1], 0 }
   0x5   :  { %13 = vsyncpa [#allocation6], 0 }
   0x6   :  { %15 = vsyncpa [#allocation6 + $0x1], 0 }
   0x7   :  { %16 = vsyncpa [#allocation4], 0 }
   0x8   :  { %18 = vsyncpa [#allocation4 + $0x1], 0  ;;  %s941_s18 = smov 0   ;;  %s943_s19 = smov 0  }
   0x9   :  { %s945_s20 = smov 0   ;;  %s947_s21 = smov 0  }
   0xa   :  { %s949_s22 = smov 0   ;;  %s951_s23 = smov 0  }
   0xb LB: > { %1236 = sst [smem:[#allocation13_spill]] %s890_s20  ;;  %s972_s24 = sadd.s32 4294967295, %s902_s23   ;;  %s902_s23 = sphi %s951_s23, %s24_s23   ;;  %s898_s22 = sphi %s949_s22, %s1265_s22   ;;  %s894_s21 = sphi %s947_s21, %s1264_s21   ;;  %s890_s20 = sphi %s945_s20, %s1260_s20   ;;  %s886_s19 = sphi %s943_s19, %s1263_s19   ;;  %s882_s18 = sphi %s941_s18, %s1262_s18  }
   0xc   : > { %s597_s25 = sadd.s32 4294967294, %s902_s23   ;;  %p58_p0 = scmp.ne.s32.totalorder %s886_s19, %s882_s18 }
   0xd   : > { %p1226_p1 = scmp.eq.s32.totalorder %s972_s24, 0  ;;  %p188_p3 = scmp.eq.s32.totalorder %s597_s25, 1 }
   0xe   : > { %p598_p5 = scmp.ge.s32.totalorder %s902_s23, 1  ;;  %p195_p7 = scmp.lt.s32.totalorder %s902_s23, 3 }
   0xf   : > { %p981_p4 = por %p1226_p1, %p58_p0  ;;  %p986_p6 = por %p188_p3, %p58_p0 }
  0x10   : > { %p991_p8 = pnand %p598_p5, %p195_p7  ;;  %s904_s29 = smov [#allocation7]  }
  0x11   : > { %s1237_s26 = scalar_select %p981_p4, 1, 0 }
  0x12   : > { %s1238_s27 = scalar_select %p986_p6, 1, 0 }
  0x13   : > { %s1239_s28 = scalar_select %p991_p8, 1, 0 }
  0x14   : > { %s207_s30 = sshll.u32 %s904_s29, 4  ;;  %p648_p9 = pneg %p991_p8  ;;  %s208_s30 = int_to_ptr.vmem [resolvable:$true] %s207_s30 }
  0x15   : > { %s36_s7 = sadd.s32 1, %s898_s22  ;;  %s1241_s3 = sld [smem:[#allocation17_spill]] }
  0x16   : > { %p1000_p11 = pnand %p648_p9, %p1226_p1 }
  0x18   : > { %p726_p13 = pneg %p1000_p11 }
  0x1b   : > { %s724_s10 = scalar_lea.hbm %s1241_s3, 256 }
  0x1c   : > { %p725_p12 = scmp.ne.s32.totalorder %s1241_s3, %s724_s10  ;;  %p731_p5 = scmp.lt.u32.totalorder %s724_s10, %s1241_s3 }
  0x1e   : > { %p727_p0 = pnand %p726_p13, %p725_p12 }
  0x20   : > { %p728_p3 = pneg %p727_p0 }
  0x22   : > { %p733_p7 = pnand %p731_p5, %p728_p3 }
  0x24   : > { %736 = shalt.err (!%p733_p7)
}
  0x25   : > { %s737_s15 = scalar_lea.vmem %s208_s30, 256  ;;  %p745_p2 = scmp.lt.s32.totalorder %s208_s30, %s208_s30 }
  0x26   : > { %p738_p9 = scmp.ne.s32.totalorder %s208_s30, %s737_s15  ;;  %p746_p6 = scmp.lt.s32.totalorder %s737_s15, %s737_s15 }
  0x28   : > { %p740_p10 = pnand %p738_p9, %p726_p13  ;;  %p747_p4 = por %p746_p6, %p745_p2 }
  0x2a   : > { %p741_p1 = pneg %p740_p10 }
  0x2c   : > { %p748_p8 = pnand %p747_p4, %p741_p1 }
  0x2e   : > { %751 = shalt.err (!%p748_p8)
}
  0x2f   : > { %s1229_s16 = smov 128   ;;  %s1230_s17 = smov 8  }
  0x30   : > { %651 = dma.hbm_to_vmem [thread:$0]  (!%p1000_p11), %s1241_s3, 256, %s208_s30, [#allocation6], %s1229_s16, %s1229_s16, %s1230_s17  }
  0x31   : > { %p38_p1 = scmp.ge.s32.totalorder %s36_s7, 2  ;;  %s45_s8 = sadd.s32 1, %s890_s20 }
  0x32   : > { %p52_p2 = scmp.ne.s32.totalorder %s890_s20, %s886_s19  ;;  %p53_p4 = scmp.eq.s32.totalorder %s902_s23, 0 }
  0x33   : > { %s1267_s7 = smov (%p38_p1, %s36_s7), 0  ;;  %p1244_p8 = scmp.eq.s32.totalorder %s972_s24, 1 }
  0x34   : > { %1242 = sst [smem:[#allocation14_spill]] %s1267_s7  ;;  %p1030_p6 = por %p53_p4, %p52_p2 }
  0x35   : > { %p1036_p10 = por %p1244_p8, %p52_p2  ;;  %s40_s10 = ssub.s32 %s898_s22, %s1267_s7 }
  0x36   : > { %p664_p11 = scmp.lt.s32.totalorder %s902_s23, 2  ;;  %p43_p12 = scmp.eq.s32.totalorder %s40_s10, 0 }
  0x37   : > { %s1245_s6 = scalar_select %p1036_p10, 1, 0 }
  0x38   : > { %s1044_s30 = sand.u32 1, %s890_s20   ;;  %s619_s13 = sshll.u32 %s898_s22, 8 }
  0x39   : > { %s601_s11 = sshll.u32 %s1044_s30, 4  ;;  %s1247_s0 = sld [smem:[#allocation16_spill]] }
  0x3a   : > { %s1048_s12 = scalar_select %p43_p12, %s890_s20, %s45_s8  }
  0x3b   : > { %s228_s29 = scalar_lea.vmem [#allocation2], %s601_s11  ;;  %p1060_p13 = pnand %p664_p11, %p1030_p6 }
  0x3c   : > { %1246 = sst [smem:[#allocation15_spill]] %s1048_s12  ;;  %s236_s10 = sshll.u32 %s228_s29, 4  ;;  %s1056_s10 = int_to_ptr.vmem [resolvable:$true] %s236_s10 }
  0x3d   : > { %s604_s17 = sshll.u32 %s1044_s30, 3  ;;  %s225_s14 = scalar_lea.sflag [#allocation3], %s1044_s30 }
  0x3e   : > { %p754_p3 = pneg %p1060_p13 }
  0x3f   : > { %s1054_s25 = scalar_lea.hbm %s1247_s0, %s619_s13  ;;  %s757_s9 = scalar_lea.hbm %s1247_s0, 512 }
  0x40   : > { %s752_s13 = scalar_lea.hbm %s1054_s25, 256  ;;  %p758_p9 = scmp.lt.u32.totalorder %s1054_s25, %s1247_s0 }
  0x41   : > { %p753_p0 = scmp.ne.s32.totalorder %s1054_s25, %s752_s13  ;;  %p759_p1 = scmp.lt.u32.totalorder %s757_s9, %s752_s13 }
  0x42   : > { %p761_p4 = scmp.lt.u32.totalorder %s752_s13, %s1054_s25 }
  0x43   : > { %p755_p5 = pnand %p754_p3, %p753_p0  ;;  %p760_p2 = por %p759_p1, %p758_p9 }
  0x45   : > { %p756_p7 = pneg %p755_p5  ;;  %p762_p6 = por %p761_p4, %p760_p2 }
  0x47   : > { %p763_p8 = pnand %p762_p6, %p756_p7 }
  0x49   : > { %766 = shalt.err (!%p763_p8)
}
  0x4a   : > { %s767_s8 = scalar_lea.vmem %s1056_s10, 256  ;;  %s907_s11 = smov [#allocation2]  }
  0x4b   : > { %p768_p11 = scmp.ne.s32.totalorder %s1056_s10, %s767_s8  ;;  %s772_s15 = sshll.u32 %s907_s11, 4  ;;  %s773_s15 = int_to_ptr.vmem [resolvable:$false] %s772_s15 }
  0x4c   : > { %s774_s3 = scalar_lea.vmem %s773_s15, 512  ;;  %p775_p5 = scmp.lt.s32.totalorder %s1056_s10, %s773_s15 }
  0x4d   : > { %p770_p12 = pnand %p768_p11, %p754_p3  ;;  %p776_p9 = scmp.lt.s32.totalorder %s774_s3, %s767_s8 }
  0x4f   : > { %p771_p0 = pneg %p770_p12  ;;  %p777_p1 = por %p776_p9, %p775_p5 }
  0x51   : > { %p778_p2 = pnand %p777_p1, %p771_p0 }
  0x53   : > { %781 = shalt.err (!%p778_p2)
}
  0x54   : > { %s1249_s13 = smov 8   ;;  %s1250_s9 = smov 128  }
  0x55   : > { %655 = dma.hbm_to_vmem [thread:$0]  (!%p1060_p13), %s1054_s25, 256, %s1056_s10, %s225_s14, %s1250_s9, %s1250_s9, %s1249_s13  }
  0x56   : > { %s605_s29 = sshll.u32 %s898_s22, 7  ;;  %s260_s3 = scalar_lea.vmem [#allocation5], %s604_s17 }
  0x57   : > { %s1101_s15 = scalar_lea.hbm %s1222_s2, %s605_s29  ;;  %s268_s0 = sshll.u32 %s260_s3, 4  ;;  %s269_s0 = int_to_ptr.vmem [resolvable:$true] %s268_s0 }
  0x58   : > { %s1251_s7 = sand.u32 1, %s902_s23   ;;  %s782_s20 = scalar_lea.hbm %s1101_s15, 128 }
  0x59   : > { %s257_s12 = scalar_lea.sflag [#allocation6], %s1251_s7  ;;  %p783_p7 = scmp.ne.s32.totalorder %s1101_s15, %s782_s20 }
  0x5a   : > { %s787_s14 = scalar_lea.hbm %s1222_s2, 256  ;;  %p788_p8 = scmp.lt.u32.totalorder %s1101_s15, %s1222_s2 }
  0x5b   : > { %p785_p4 = pnand %p783_p7, %p754_p3  ;;  %p789_p11 = scmp.lt.u32.totalorder %s787_s14, %s782_s20 }
  0x5c   : > { %p791_p0 = scmp.lt.u32.totalorder %s782_s20, %s1101_s15 }
  0x5d   : > { %p786_p6 = pneg %p785_p4  ;;  %p790_p12 = por %p789_p11, %p788_p8 }
  0x5f   : > { %p792_p5 = por %p791_p0, %p790_p12 }
  0x61   : > { %p793_p9 = pnand %p792_p5, %p786_p6 }
  0x63   : > { %796 = shalt.err (!%p793_p9)
}
  0x64   : > { %s797_s7 = scalar_lea.vmem %s269_s0, 128  ;;  %s908_s17 = smov [#allocation5]  }
  0x65   : > { %p798_p1 = scmp.ne.s32.totalorder %s269_s0, %s797_s7  ;;  %s802_s9 = sshll.u32 %s908_s17, 4  ;;  %s803_s9 = int_to_ptr.vmem [resolvable:$false] %s802_s9 }
  0x66   : > { %s804_s29 = scalar_lea.vmem %s803_s9, 256  ;;  %p805_p4 = scmp.lt.s32.totalorder %s269_s0, %s803_s9 }
  0x67   : > { %p800_p2 = pnand %p798_p1, %p754_p3  ;;  %p806_p10 = scmp.lt.s32.totalorder %s804_s29, %s797_s7 }
  0x69   : > { %p801_p7 = pneg %p800_p2  ;;  %p807_p8 = por %p806_p10, %p805_p4 }
  0x6b   : > { %p808_p11 = pnand %p807_p8, %p801_p7 }
  0x6d   : > { %811 = shalt.err (!%p808_p11)
}
  0x6e   : > { %658 = dma.hbm_to_vmem [thread:$0]  (!%p1060_p13), %s1101_s15, 128, %s269_s0, %s257_s12  }
  0x6f   : > { %p1252_p6 = scmp.ne.s32.totalorder %s1239_s28, 0 }
  0x70   : > { %s1129_s20 = sand.u32 (!%p1252_p6), 1, %s886_s19   ;;  %p1253_p3 = scmp.ne.s32.totalorder (!%p1252_p6), %s1237_s26, 0 }
  0x71   : > { %277 = sbr.rel (%p1252_p6) target bundleno = 392 (0x188), region = 40  ;;  %s607_s11 = sshll.u32 (!%p1252_p6), %s1129_s20, 4 }
  0x72   : > { %s280_s8 = scalar_lea.sflag (!%p1252_p6), [#allocation3], %s1129_s20  ;;  %s283_s3 = scalar_lea.vmem (!%p1252_p6), [#allocation2], %s607_s11 }
  0x78   : > { %865 = dma.done.wait (%p1253_p3), %s280_s8, 256  }
  0x79   : > { %867 = vsyncadd (%p1253_p3), %s280_s8, 4294967040  ;;  %s288_s0 = sand.u32 1, %s972_s24   ;;  %s608_s28 = sshll.u32 %s1129_s20, 3 }
  0x7a   : > { %s289_s16 = scalar_lea.sflag [#allocation6], %s288_s0  ;;  %s1141_s12 = scalar_lea.vmem [#allocation5], %s608_s28 }
  0x7b   : > { %869 = dma.done.wait (%p1253_p3), %s289_s16, 128  }
  0x7c   : > { %871 = vsyncadd (%p1253_p3), %s289_s16, 4294967168  ;;  %p1254_p10 = scmp.eq.s32.totalorder %s972_s24, 0 }
  0x7e   : > { %873 = dma.done.wait (%p1254_p10), [#allocation6], 256   ;;  %p1255_p13 = pmov %p1254_p10 }
  0x7f   : > { %p335_p12 = scmp.lt.s32.totalorder %s894_s21, 1  ;;  %v909_v0 = vmov 0   ;;  %vm359_vm0 = vcmask 195584   ;;  %v346_v1 = vld [vmem:[%s283_s3] sm:$0xff]  ;;  %v347_v2 = vld [vmem:[%s283_s3 + $0x8] sm:$0xff]  ;;  %s616_s17 = sshll.u32 %s894_s21, 7 }
  0x80   : > { %875 = vsyncadd (%p1255_p13), [#allocation6], 4294967040  ;;  %719 = vset.pattern.permute.xlu0 %v909_v0  ;;  %v634_v3 = vpack.c.bf16 %v347_v2, %v346_v1  ;;  %v342_v4 = vld [vmem:[#allocation7] sm:$0xff]  ;;  %v345_v5 = vld [vmem:[%s1224_s4 + $0x8] sm:$0xff]  ;;  %s334_s9 = scalar_lea.vmem [#allocation8], %s608_s28  ;;  %vm450_vm1 = vcmask 523264   ;;  %s1171_s3 = scalar_lea.hbm %s1225_s5, %s616_s17 }
  0x81   : > { %s336_s15 = scalar_select %p335_p12, %s894_s21, 1  ;;  %631 = vmatprep.mubr.msk.f32.mxu0 %vm359_vm0, %v342_v4  ;;  %356 = vperm.xlu0 %719, %v345_v5   ;;  %v344_v7 = vld [vmem:[%s1224_s4] sm:$0xff]  ;;  %v343_v8 = vld [vmem:[#allocation7 + $0x8] sm:$0xff] }
  0x82   : > { %635 = vmatprep.subr.bf16.mxu0 %v634_v3  ;;  %v441_v18 = vld [vmem:[%s1141_s12] sm:$0xff]  ;;  %s467_s29 = sshll.u32 %s334_s9, 4  ;;  %s453_s0 = scalar_lea.sflag [#allocation4], %s1129_s20  ;;  %s1173_s29 = int_to_ptr.vmem [resolvable:$true] %s467_s29 }
  0x83   : > { %s611_s25 = sshll.u32 %s336_s15, 3  ;;  %637 = vmatpush3.bf16.msra.mxu0 %v634_v3  ;;  %s812_s21 = scalar_lea.vmem %s1173_s29, 128 }
  0x84   : > { %s341_s30 = scalar_lea.vmem %s1221_s1, %s611_s25  ;;  %p813_p0 = scmp.ne.s32.totalorder %s1173_s29, %s812_s21 }
  0x85   : > { %v348_v6 = vld [vmem:[%s341_s30] sm:$0xff]  ;;  %351 = vperm.xlu0 %719, %v344_v7   ;;  %p1256_p5 = scmp.ne.s32.totalorder %s1245_s6, 0  ;;  %s910_s28 = smov [#allocation8]  }
  0x86   : > { %629 = vmatprep.subr.mxu0 %v348_v6  ;;  %s816_s16 = sshll.u32 %s910_s28, 4  ;;  %s817_s16 = int_to_ptr.vmem [resolvable:$false] %s816_s16 }
  0x87   : > { %630 = vmatpush3.msra.mxu0 %v348_v6  ;;  %p814_p9 = pnand %p813_p0, %p1256_p5  ;;  %s818_s12 = scalar_lea.vmem %s817_s16, 256 }
  0x88   : > { %632 = vmatmul.mubr.msk.f32.vlgmr.msra.gmra.mrb[0].mxu0 %vm359_vm0, %v343_v8  ;;  %p819_p2 = scmp.lt.s32.totalorder %s1173_s29, %s817_s16  ;;  %p820_p7 = scmp.lt.s32.totalorder %s818_s12, %s812_s21 }
  0x89   : > { %p815_p1 = pneg %p814_p9 }
  0x8a   : > { %p821_p4 = por %p820_p7, %p819_p2 }
  0x8c   : > { %p822_p8 = pnand %p821_p4, %p815_p1 }
 0x100   : > { %v357_v9 = vpop.permute.xlu0 %356 }
 0x104   : > { %v352_v16 = vpop.permute.xlu0 %351 }
 0x15b   : > { %v633_v10 = vpop.f32.mrb[0].mxu0 }
 0x15c   : > { %v438_v11 = vadd.f32 %v633_v10, %v357_v9  ;;  %v432_v12 = vpop.f32.mrb[1].mxu0 }
 0x15d   : > { %v433_v17 = vadd.f32 %v432_v12, %v352_v16 }
 0x15e   : > { %v614_v13 = vmul.f32 -1.442695, %v438_v11 }
 0x15f   : > { %v442_v19 = vadd.f32 %v441_v18, %v433_v17 }
 0x160   : > { %720 = vpow2.f32 %v614_v13 }
 0x16a   : > { %v721_v14 = vpop.eup %720 }
 0x16b   : > { %v446_v15 = vadd.f32 1.0, %v721_v14 }
 0x16d   : > { %722 = vrcp.f32 %v446_v15 }
 0x177   : > { %v723_v20 = vpop.eup %722 }
 0x178   : > { %v449_v21 = vmul.f32 %v723_v20, %v442_v19 }
 0x17a   : > { %451 = vst.msk [vmem:[%s334_s9] sm:$0xff] %vm450_vm1, %v449_v21 }
 0x17b   : > { %825 = shalt.err (!%p822_p8)
}
 0x17c   : > { %s826_s20 = scalar_lea.hbm %s1171_s3, 128  ;;  %s830_s10 = scalar_lea.hbm %s1225_s5, 256 }
 0x17d   : > { %p827_p11 = scmp.ne.s32.totalorder %s1171_s3, %s826_s20  ;;  %p831_p10 = scmp.lt.u32.totalorder %s1171_s3, %s1225_s5 }
 0x17e   : > { %p832_p13 = scmp.lt.u32.totalorder %s830_s10, %s826_s20  ;;  %p834_p0 = scmp.lt.u32.totalorder %s826_s20, %s1171_s3 }
 0x17f   : > { %p828_p6 = pnand %p827_p11, %p1256_p5 }
 0x180   : > { %p833_p12 = por %p832_p13, %p831_p10 }
 0x181   : > { %p829_p3 = pneg %p828_p6 }
 0x182   : > { %p835_p9 = por %p834_p0, %p833_p12 }
 0x184   : > { %p836_p1 = pnand %p835_p9, %p829_p3 }
 0x186   : > { %839 = shalt.err (!%p836_p1)
}
 0x187   : > { %646 = dma.vmem_to_hbm [thread:$0]  (%p1256_p5), %s1173_s29, 128, %s1171_s3, %s453_s0  }
 0x188 PF: > { %s479_s26 = sand.u32 1, %s882_s18   ;;  %p1257_p2 = scmp.ne.s32.totalorder %s1238_s27, 0 }
 0x189   : > { %p1258_p7 = scmp.ge.s32.totalorder %s902_s23, 2  ;;  %s480_s13 = scalar_lea.sflag [#allocation4], %s479_s26 }
 0x18b   : > { %p660_p4 = pnand %p1258_p7, %p1257_p2 }
 0x18d   : > { %877 = dma.done.wait (!%p660_p4), %s480_s13, 128  }
 0x18e   : > { %879 = vsyncadd (!%p660_p4), %s480_s13, 4294967168  ;;  %s24_s23 = sadd.s32 1, %s902_s23   ;;  %s1259_s24 = sld [smem:[#allocation13_spill]] }
 0x18f   : > { %p21_p8 = scmp.ge.s32.totalorder %s24_s23, 4   ;;  %s1260_s20 = sld [smem:[#allocation15_spill]] }
 0x190   : > { %s1261_s6 = sld [smem:[#allocation14_spill]]  ;;  %s1262_s18 = smov %s886_s19 }
 0x191   : > { %s1264_s21 = smov %s898_s22  ;;  %23 = sbr.rel (!%p21_p8) target bundleno = 11 (0xb), region = 105 }
 0x194   : > { %s1263_s19 = smov %s1259_s24 }
 0x196   : > { %s1265_s22 = smov %s1261_s6 }
 0x198   :  { %485 = vsyncpa [#allocation3], 1 }
 0x199   :  { %487 = vsyncpa [#allocation3 + $0x1], 1 }
 0x19a   :  { %488 = vsyncpa [#allocation6], 1 }
 0x19b   :  { %490 = vsyncpa [#allocation6 + $0x1], 1 }
 0x19c   :  { %491 = vsyncpa [#allocation4], 1 }
 0x19d   :  { %493 = vsyncpa [#allocation4 + $0x1], 1 }

</bundles_post_ra>
